<compile_context>
chip_gen: v7x
topology: tpu7x:2x2x1
jax: 0.10.0
libtpu: 0.0.40
codegen_flags: <defaults>
</compile_context>

<pallas_src>
import functools

import jax
import jax.numpy as jnp
import numpy as np
from jax import lax
from jax.experimental import pallas as pl
from jax.experimental.pallas import tpu as pltpu


def _layer_norm(x, eps=1e-5):
    # F.layer_norm over the last dim, no affine params.
    mean = jnp.mean(x, axis=-1, keepdims=True)
    var = jnp.mean(jnp.square(x - mean), axis=-1, keepdims=True)
    return (x - mean) * lax.rsqrt(var + eps)


def _decoder_layer_kernel(
    z1_ref, uq_ref, cat_ref, uk_ref, uv_ref, r_ref,
    wq_ref, wk_ref, wv_ref, rwb_ref, rrb_ref,
    wo_ref, bo_ref, wf1_ref, bf1_ref, wf2_ref, bf2_ref,
    out_ref,
    kT_ref, vT_ref, av_ref,
    *, n_head, d_head, qlen, mlen, local_size, scale, q_block, w_pad):
    f32 = jnp.float32
    bf16 = jnp.bfloat16
    TQ = q_block
    klen = kT_ref.shape[1]

    t = pl.program_id(1)
    q0 = t * TQ
    mm = (((1,), (0,)), ((), ()))      # (M,K) @ (K,N)
    mm_rt = (((1,), (1,)), ((), ()))   # (M,K) @ (N,K): contract trailing dims of both

    # ---- K / V: depend only on the batch -> compute once per batch (t == 0) and cache.
    #      cat is channel-first (D, klen), so W_k @ cat lands directly in head-major layout.
    @pl.when(t == 0)
    def _():
        cat = cat_ref[0]                                              # (D, klen) bf16
        kT = lax.dot_general(wk_ref[...], cat, mm, preferred_element_type=f32)
        vT = lax.dot_general(wv_ref[...], cat, mm, preferred_element_type=f32)
        kT_ref[...] = (kT + uk_ref[0].astype(f32)).astype(bf16)       # (nd, klen)
        vT_ref[...] = (vT + uv_ref[0].astype(f32)).astype(bf16)       # (nd, klen)

    # ---- queries for this tile (sequence-major); softmax scale folded into Q.
    z1 = z1_ref[0]                                                    # (TQ, D) f32
    q = lax.dot_general(z1.astype(bf16), wq_ref[...], mm,
                        preferred_element_type=f32) + uq_ref[0].astype(f32)
    rw_q = ((q + rwb_ref[...]) * scale).astype(bf16)
    rr_q = ((q + rrb_ref[...]) * scale).astype(bf16)

    # ---- positional keys: dynamic (sublane-aligned) window of the pre-projected,
    #      zero-padded R so the relative shift never reads out of bounds.
    b_off = (qlen - TQ) - q0
    if TQ % 8 == 0:
        b_off = pl.multiple_of(b_off, 8)

    # Additive attention mask (causal beyond mlen + optional local window). Finite value so
    # even a fully masked row can never produce NaNs (reference would give NaN there).
    row_i = lax.broadcasted_iota(jnp.int32, (TQ, klen), 0) + q0
    col_j = lax.broadcasted_iota(jnp.int32, (TQ, klen), 1)
    masked = (col_j > row_i + mlen) | (col_j <= row_i + (mlen - local_size))
    maskadd = jnp.where(masked, f32(-1e30), f32(0.0))

    shift = w_pad - (TQ - 1)
    for h in range(n_head):            # static unroll over heads
        sl = slice(h * d_head, (h + 1) * d_head)
        kT_h = kT_ref[sl, :]                                          # (d_head, klen) bf16
        r_h = r_ref[pl.ds(b_off, w_pad), sl]                          # (w_pad, d_head) bf16
        ac = lax.dot_general(rw_q[:, sl], kT_h, mm, preferred_element_type=f32)
        bd_full = lax.dot_general(rr_q[:, sl], r_h, mm_rt,
                                  preferred_element_type=f32)         # (TQ, w_pad)
        # Relative shift: row il needs bd_full[il, (TQ-1-il)+j]  ->  one strided lane roll
        # (per-row roll amount = shift + il, matching jnp.roll semantics), then keep klen.
        bd = pltpu.roll(bd_full, shift, 1, stride=1, stride_axis=0)[:, :klen]

        s = ac + bd + maskadd
        m = jnp.max(s, axis=-1, keepdims=True)
        e = jnp.exp(s - m)
        p = e * pl.reciprocal(jnp.sum(e, axis=-1, keepdims=True), approx=True)
        av_ref[:, sl] = lax.dot_general(p.astype(bf16), vT_ref[sl, :], mm_rt,
                                        preferred_element_type=f32).astype(bf16)

    attn_out = lax.dot_general(av_ref[...], wo_ref[...], mm,
                               preferred_element_type=f32) + bo_ref[...]
    # TODO(synk): VariationalHidDropout / VariationalAttnDropout masks are identity
    # (eval mode / dropout=0); not modeled.
    out1 = _layer_norm(attn_out + z1)             # post-lnorm attention output

    h1 = jnp.maximum(
        lax.dot_general(out1.astype(bf16), wf1_ref[...], mm,
                        preferred_element_type=f32) + bf1_ref[...], 0.0)
    h2 = lax.dot_general(h1.astype(bf16), wf2_ref[...], mm,
                         preferred_element_type=f32) + bf2_ref[...]
    out_ref[0] = _layer_norm(h2 + out1)           # post-lnorm FF output


def _device_kind():
    try:
        return jax.devices()[0].device_kind.lower()
    except Exception:
        return ""


def _has_big_vmem():
    # v4 / v5 / v6 TensorCores have 128 MiB of VMEM; v7x-class parts only 64 MiB per TC.
    return any(tag in _device_kind() for tag in ("v4", "v5", "v6"))


def rel_decoder_layer_pallas(z1ss, uss, z0, pos_emb, params, *, n_head, d_head,
                             local_size=None, q_block=None):
    B, d_model, qlen = z1ss.shape
    mlen = z0.shape[2]
    klen = qlen + mlen
    rlen = pos_emb.shape[2]
    assert rlen == klen, "relative position embedding must cover klen positions"
    nd = n_head * d_head
    ls = int(local_size) if local_size is not None else 1000
    scale = 1.0 / (d_head ** 0.5)
    f32, bf16 = jnp.float32, jnp.bfloat16

    # q tiling keeps the resident set O(TQ*klen); larger tiles on 128-MiB VMEM parts.
    if q_block is None:
        if _has_big_vmem() and qlen % 256 == 0:
            q_block = 256
        elif qlen % 128 == 0:
            q_block = 128
        else:
            q_block = qlen
    TQ = int(q_block)
    assert qlen % TQ == 0 and (TQ % 8 == 0 or TQ == qlen)
    nqt = qlen // TQ

    # Lane width of the per-head BD tile (padded to a multiple of 128 so the strided roll
    # operates on clean lane tiles); rows of padded R needed so every window stays in range.
    w_pad = -(-(klen + TQ - 1) // 128) * 128
    r_rows = (qlen - TQ) + w_pad

    # ---- activations (cat / u_k / u_v stay channel-first: no layout transposes needed) ----
    cat_cf = jnp.concatenate([z0, z1ss], axis=2).astype(bf16)            # (B, D, klen)
    z1_t = jnp.transpose(z1ss, (0, 2, 1)).astype(f32)                    # (B, qlen, D)
    uq_t = jnp.transpose(uss[:, 0:nd, mlen:], (0, 2, 1)).astype(bf16)    # (B, qlen, nd)
    uk_cf = uss[:, nd:2 * nd, :].astype(bf16)                            # (B, nd, klen)
    uv_cf = uss[:, 2 * nd:3 * nd, :].astype(bf16)                        # (B, nd, klen)

    # Positional projection hoisted out of the kernel (batch / q-tile invariant), then
    # zero-padded: padded rows are only ever reached at masked positions.
    pos_t = jnp.transpose(pos_emb[0], (1, 0)).astype(f32)                # (klen, D)
    r_full = jnp.dot(pos_t, jnp.transpose(params["w_r"]).astype(f32))    # (klen, nd)
    r_pad = jnp.concatenate(
        [r_full, jnp.zeros((r_rows - klen, nd), f32)], axis=0).astype(bf16)

    # ---- weights: MXU-friendly layouts, bf16 ----
    w_qkv = params["w_qkv"]
    wq_t = jnp.transpose(w_qkv[0:nd]).astype(bf16)                       # (D, nd)
    wk_cf = w_qkv[nd:2 * nd].astype(bf16)                                # (nd, D)
    wv_cf = w_qkv[2 * nd:3 * nd].astype(bf16)                            # (nd, D)
    wo_t = jnp.transpose(params["w_o"]).astype(bf16)                     # (nd, D)
    wf1_t = jnp.transpose(params["w_ff1"]).astype(bf16)                  # (D, d_inner)
    wf2_t = jnp.transpose(params["w_ff2"]).astype(bf16)                  # (d_inner, D)
    d_inner = wf1_t.shape[1]
    rwb = params["r_w_bias"].reshape(1, nd).astype(f32)
    rrb = params["r_r_bias"].reshape(1, nd).astype(f32)
    bo = params["b_o"].reshape(1, d_model).astype(f32)
    bf1 = params["b_ff1"].reshape(1, d_inner).astype(f32)
    bf2 = params["b_ff2"].reshape(1, d_model).astype(f32)

    kernel = functools.partial(
        _decoder_layer_kernel, n_head=n_head, d_head=d_head, qlen=qlen, mlen=mlen,
        local_size=ls, scale=scale, q_block=TQ, w_pad=w_pad)

    def shared(x):
        # TODO(synk): single-buffer these grid-invariant blocks (pl.Buffered(1)) once
        # pipeline_mode plumbing is verified on the target jax version; default-buffered here.
        ndim = x.ndim
        return pl.BlockSpec(x.shape, lambda b, t: (0,) * ndim)

    vmem_limit = (100 * 1024 * 1024) if _has_big_vmem() else (48 * 1024 * 1024)

    out = pl.pallas_call(
        kernel,
        out_shape=jax.ShapeDtypeStruct((B, qlen, d_model), f32),
        grid=(B, nqt),
        in_specs=[
            pl.BlockSpec((1, TQ, d_model), lambda b, t: (b, t, 0)),     # z1 query tile
            pl.BlockSpec((1, TQ, nd), lambda b, t: (b, t, 0)),          # u injection, q slice
            pl.BlockSpec((1, d_model, klen), lambda b, t: (b, 0, 0)),   # [mems ; z1] channel-first
            pl.BlockSpec((1, nd, klen), lambda b, t: (b, 0, 0)),        # u injection, k slice
            pl.BlockSpec((1, nd, klen), lambda b, t: (b, 0, 0)),        # u injection, v slice
            shared(r_pad), shared(wq_t), shared(wk_cf), shared(wv_cf),
            shared(rwb), shared(rrb), shared(wo_t), shared(bo),
            shared(wf1_t), shared(bf1), shared(wf2_t), shared(bf2),
        ],
        out_specs=pl.BlockSpec((1, TQ, d_model), lambda b, t: (b, t, 0)),
        scratch_shapes=[
            pltpu.VMEM((nd, klen), bf16),     # K^T (head-major), cached per batch
            pltpu.VMEM((nd, klen), bf16),     # V^T (head-major), cached per batch
            pltpu.VMEM((TQ, nd), bf16),       # per-head attention outputs (lane-dense)
        ],
        compiler_params=pltpu.CompilerParams(
            dimension_semantics=("parallel", "arbitrary"),
            vmem_limit_bytes=vmem_limit),
    )(z1_t, uq_t, cat_cf, uk_cf, uv_cf, r_pad, wq_t, wk_cf, wv_cf,
      rwb, rrb, wo_t, bo, wf1_t, bf1, wf2_t, bf2)

    # TODO(synk): in a DEQ fixed-point loop keep the solver state sequence-major so these
    # layout transposes are not paid on every iteration.
    return jnp.transpose(out, (0, 2, 1))   # back to PyTorch layout (B, d_model, qlen)


# --- pure-JAX f32 reference mirroring the PyTorch forward (sanity check) ---
def _layer_norm_last(x, eps=1e-5):
    mean = jnp.mean(x, axis=-1, keepdims=True)
    var = jnp.mean(jnp.square(x - mean), axis=-1, keepdims=True)
    return (x - mean) / jnp.sqrt(var + eps)


def reference_forward(z1ss, uss, z0, pos_emb, p, *, n_head, d_head, local_size=None):
    prec = lax.Precision.HIGHEST
    B, D, qlen = z1ss.shape
    mlen = z0.shape[2]
    nd = n_head * d_head
    scale = 1.0 / d_head ** 0.5
    cat = jnp.concatenate([z0, z1ss], axis=2)
    klen = cat.shape[2]
    w_heads = jnp.einsum("od,bdl->bol", p["w_qkv"], cat, precision=prec) + uss
    r_head_k = jnp.einsum("od,dl->ol", p["w_r"], pos_emb[0], precision=prec)
    w_q, w_k, w_v = w_heads[:, :nd], w_heads[:, nd:2 * nd], w_heads[:, 2 * nd:]
    w_q = w_q[:, :, -qlen:].reshape(B, n_head, d_head, qlen)
    w_k = w_k.reshape(B, n_head, d_head, klen)
    w_v = w_v.reshape(B, n_head, d_head, klen)
    r_k = r_head_k.reshape(n_head, d_head, klen)
    rw_q = w_q + p["r_w_bias"][None, :, :, None]
    rr_q = w_q + p["r_r_bias"][None, :, :, None]
    ac = jnp.einsum("bndi,bndj->bnij", rw_q, w_k, precision=prec)
    bd = jnp.einsum("bndi,ndj->bnij", rr_q, r_k, precision=prec)
    bd_p = jnp.pad(bd, ((0, 0), (0, 0), (0, 0), (1, 0)))
    bd = bd_p.reshape(B, n_head, klen + 1, qlen)[:, :, 1:].reshape(B, n_head, qlen, klen)
    score = (ac + bd) * scale
    ls = local_size if local_size is not None else 1000
    i = jnp.arange(qlen)[:, None]
    j = jnp.arange(klen)[None, :]
    mask = (j > i + mlen) | (j <= i + mlen - ls)
    score = jnp.where(mask[None, None], -jnp.inf, score)
    prob = jax.nn.softmax(score, axis=-1)
    attn_vec = jnp.einsum("bnij,bndj->bndi", prob, w_v, precision=prec).reshape(B, nd, qlen)
    attn_out = jnp.einsum("od,bdl->bol", p["w_o"], attn_vec, precision=prec) + p["b_o"][None, :, None]
    out = attn_out + z1ss
    out = jnp.transpose(_layer_norm_last(jnp.transpose(out, (0, 2, 1))), (0, 2, 1))
    h1 = jax.nn.relu(jnp.einsum("od,bdl->bol", p["w_ff1"], out, precision=prec)
                     + p["b_ff1"][None, :, None])
    h2 = jnp.einsum("od,bdl->bol", p["w_ff2"], h1, precision=prec) + p["b_ff2"][None, :, None]
    ff = h2 + out
    return jnp.transpose(_layer_norm_last(jnp.transpose(ff, (0, 2, 1))), (0, 2, 1))


if __name__ == "__main__":
    n_head, d_head, d_model, d_inner = 2, 8, 32, 64
    nd = n_head * d_head

    key = jax.random.PRNGKey(0)
    keys = jax.random.split(key, 20)
    params = {
        "w_qkv": 0.1 * jax.random.normal(keys[0], (3 * nd, d_model), jnp.float32),
        "w_r":   0.1 * jax.random.normal(keys[1], (nd, d_model), jnp.float32),
        "r_w_bias": jax.random.uniform(keys[2], (n_head, d_head), jnp.float32, -0.05, 0.05),
        "r_r_bias": jax.random.uniform(keys[3], (n_head, d_head), jnp.float32, -0.05, 0.05),
        "w_o":   0.1 * jax.random.normal(keys[4], (d_model, nd), jnp.float32),
        "b_o":   0.01 * jax.random.normal(keys[5], (d_model,), jnp.float32),
        "w_ff1": 0.1 * jax.random.normal(keys[6], (d_inner, d_model), jnp.float32),
        "b_ff1": 0.01 * jax.random.normal(keys[7], (d_inner,), jnp.float32),
        "w_ff2": 0.1 * jax.random.normal(keys[8], (d_model, d_inner), jnp.float32),
        "b_ff2": 0.01 * jax.random.normal(keys[9], (d_model,), jnp.float32),
    }

    def run_case(case_keys, bsz, qlen, mlen, local_size, q_block):
        klen = qlen + mlen
        z1ss = jax.random.normal(case_keys[0], (bsz, d_model, qlen), jnp.float32)      # hidden state
        uss = 0.5 * jax.random.normal(case_keys[1], (bsz, 3 * nd, klen), jnp.float32)  # input injection
        z0 = jax.random.normal(case_keys[2], (bsz, d_model, mlen), jnp.float32)        # mems
        pos_emb = jax.random.normal(case_keys[3], (1, d_model, klen), jnp.float32)     # rel pos emb
        out = rel_decoder_layer_pallas(z1ss, uss, z0, pos_emb, params,
                                       n_head=n_head, d_head=d_head,
                                       local_size=local_size, q_block=q_block)
        out = jax.block_until_ready(out)
        ref = reference_forward(z1ss, uss, z0, pos_emb, params,
                                n_head=n_head, d_head=d_head, local_size=local_size)
        # Kernel matmuls run in bf16 (f32 accumulation) with approx softmax reciprocal;
        # reference is full f32.
        np.testing.assert_allclose(np.asarray(out), np.asarray(ref), rtol=3e-2, atol=3e-2)

    # case 1: single q tile, full causal attention over mems
    run_case(keys[10:14], bsz=2, qlen=8, mlen=4, local_size=None, q_block=None)
    # case 2: multiple q tiles (exercises the per-batch K/V cache, the dynamic R window and
    # the strided-roll relative shift across tiles) plus a local attention window
    run_case(keys[14:18], bsz=2, qlen=16, mlen=8, local_size=6, q_block=8)

    print("KERNEL_OK")
</pallas_src>

<mosaic_0001>
module attributes {stable_mosaic.version = 11 : i64} {
  func.func @_decoder_layer_kernel(%arg0: i32, %arg1: i32, %arg2: memref<1x8x32xf32, #tpu.memory_space<vmem>>, %arg3: memref<1x8x16xbf16, #tpu.memory_space<vmem>>, %arg4: memref<1x32x12xbf16, #tpu.memory_space<vmem>>, %arg5: memref<1x16x12xbf16, #tpu.memory_space<vmem>>, %arg6: memref<1x16x12xbf16, #tpu.memory_space<vmem>>, %arg7: memref<128x16xbf16, #tpu.memory_space<vmem>>, %arg8: memref<32x16xbf16, #tpu.memory_space<vmem>>, %arg9: memref<16x32xbf16, #tpu.memory_space<vmem>>, %arg10: memref<16x32xbf16, #tpu.memory_space<vmem>>, %arg11: memref<1x16xf32, #tpu.memory_space<vmem>>, %arg12: memref<1x16xf32, #tpu.memory_space<vmem>>, %arg13: memref<16x32xbf16, #tpu.memory_space<vmem>>, %arg14: memref<1x32xf32, #tpu.memory_space<vmem>>, %arg15: memref<32x64xbf16, #tpu.memory_space<vmem>>, %arg16: memref<1x64xf32, #tpu.memory_space<vmem>>, %arg17: memref<64x32xbf16, #tpu.memory_space<vmem>>, %arg18: memref<1x32xf32, #tpu.memory_space<vmem>>, %arg19: memref<1x8x32xf32, #tpu.memory_space<vmem>>, %arg20: memref<16x12xbf16, #tpu.memory_space<vmem>>, %arg21: memref<16x12xbf16, #tpu.memory_space<vmem>>, %arg22: memref<8x16xbf16, #tpu.memory_space<vmem>>) attributes {dimension_semantics = [#tpu.dimension_semantics<parallel>, #tpu.dimension_semantics<arbitrary>], iteration_bounds = array<i64: 2, 1>, scalar_prefetch = 0 : i64, scratch_operands = 3 : i64, tpu.core_type = #tpu.core_type<tc>, window_params = [{transform_indices = @transform_0, window_bounds = array<i64: 1, 8, 32>}, {transform_indices = @transform_1, window_bounds = array<i64: 1, 8, 16>}, {transform_indices = @transform_2, window_bounds = array<i64: 1, 32, 12>}, {transform_indices = @transform_3, window_bounds = array<i64: 1, 16, 12>}, {transform_indices = @transform_4, window_bounds = array<i64: 1, 16, 12>}, {pipeline_mode = #tpu.pipeline_mode<synchronous>, transform_indices = @transform_5, window_bounds = array<i64: 128, 16>}, {pipeline_mode = #tpu.pipeline_mode<synchronous>, transform_indices = @transform_6, window_bounds = array<i64: 32, 16>}, {pipeline_mode = #tpu.pipeline_mode<synchronous>, transform_indices = @transform_7, window_bounds = array<i64: 16, 32>}, {pipeline_mode = #tpu.pipeline_mode<synchronous>, transform_indices = @transform_8, window_bounds = array<i64: 16, 32>}, {pipeline_mode = #tpu.pipeline_mode<synchronous>, transform_indices = @transform_9, window_bounds = array<i64: 1, 16>}, {pipeline_mode = #tpu.pipeline_mode<synchronous>, transform_indices = @transform_10, window_bounds = array<i64: 1, 16>}, {pipeline_mode = #tpu.pipeline_mode<synchronous>, transform_indices = @transform_11, window_bounds = array<i64: 16, 32>}, {pipeline_mode = #tpu.pipeline_mode<synchronous>, transform_indices = @transform_12, window_bounds = array<i64: 1, 32>}, {pipeline_mode = #tpu.pipeline_mode<synchronous>, transform_indices = @transform_13, window_bounds = array<i64: 32, 64>}, {pipeline_mode = #tpu.pipeline_mode<synchronous>, transform_indices = @transform_14, window_bounds = array<i64: 1, 64>}, {pipeline_mode = #tpu.pipeline_mode<synchronous>, transform_indices = @transform_15, window_bounds = array<i64: 64, 32>}, {pipeline_mode = #tpu.pipeline_mode<synchronous>, transform_indices = @transform_16, window_bounds = array<i64: 1, 32>}, {transform_indices = @transform_17, window_bounds = array<i64: 1, 8, 32>}]} {
    %c8_i32 = arith.constant 8 : i32
    %0 = arith.muli %arg1, %c8_i32 : i32
    %c0_i32 = arith.constant 0 : i32
    %1 = arith.cmpi eq, %arg1, %c0_i32 : i32
    %2 = arith.extui %1 : i1 to i32
    %c0_i32_0 = arith.constant 0 : i32
    %3 = arith.cmpi ne, %2, %c0_i32_0 : i32
    scf.if %3 {
      %c0_72 = arith.constant 0 : index
      %c0_73 = arith.constant 0 : index
      %c0_74 = arith.constant 0 : index
      %154 = vector.load %arg4[%c0_72, %c0_73, %c0_74] : memref<1x32x12xbf16, #tpu.memory_space<vmem>>, vector<1x32x12xbf16>
      %155 = vector.shape_cast %154 : vector<1x32x12xbf16> to vector<32x12xbf16>
      %c0_75 = arith.constant 0 : index
      %c0_76 = arith.constant 0 : index
      %156 = vector.load %arg9[%c0_75, %c0_76] : memref<16x32xbf16, #tpu.memory_space<vmem>>, vector<16x32xbf16>
      %cst_77 = arith.constant dense<0.000000e+00> : vector<16x12xf32>
      %157 = tpu.matmul %156, %155, %cst_77 {dimension_numbers = #tpu.dot_dimension_numbers<[1], [0], [0], [1], [0, 0, 1, 1], [], []>} : vector<16x32xbf16>, vector<32x12xbf16>, vector<16x12xf32> -> vector<16x12xf32>
      %c0_78 = arith.constant 0 : index
      %c0_79 = arith.constant 0 : index
      %158 = vector.load %arg10[%c0_78, %c0_79] : memref<16x32xbf16, #tpu.memory_space<vmem>>, vector<16x32xbf16>
      %cst_80 = arith.constant dense<0.000000e+00> : vector<16x12xf32>
      %159 = tpu.matmul %158, %155, %cst_80 {dimension_numbers = #tpu.dot_dimension_numbers<[1], [0], [0], [1], [0, 0, 1, 1], [], []>} : vector<16x32xbf16>, vector<32x12xbf16>, vector<16x12xf32> -> vector<16x12xf32>
      %c0_81 = arith.constant 0 : index
      %c0_82 = arith.constant 0 : index
      %c0_83 = arith.constant 0 : index
      %160 = vector.load %arg5[%c0_81, %c0_82, %c0_83] : memref<1x16x12xbf16, #tpu.memory_space<vmem>>, vector<1x16x12xbf16>
      %161 = vector.shape_cast %160 : vector<1x16x12xbf16> to vector<16x12xbf16>
      %162 = arith.extf %161 : vector<16x12xbf16> to vector<16x12xf32>
      %163 = arith.addf %157, %162 : vector<16x12xf32>
      %164 = arith.truncf %163 : vector<16x12xf32> to vector<16x12xbf16>
      %c0_84 = arith.constant 0 : index
      %c0_85 = arith.constant 0 : index
      %165 = vector.load %arg20[%c0_84, %c0_85] : memref<16x12xbf16, #tpu.memory_space<vmem>>, vector<16x12xbf16>
      tpu.vector_store %arg20[%c0_84, %c0_85], %164 {strides = array<i32>} : memref<16x12xbf16, #tpu.memory_space<vmem>>, vector<16x12xbf16>,
      %c0_86 = arith.constant 0 : index
      %c0_87 = arith.constant 0 : index
      %c0_88 = arith.constant 0 : index
      %166 = vector.load %arg6[%c0_86, %c0_87, %c0_88] : memref<1x16x12xbf16, #tpu.memory_space<vmem>>, vector<1x16x12xbf16>
      %167 = vector.shape_cast %166 : vector<1x16x12xbf16> to vector<16x12xbf16>
      %168 = arith.extf %167 : vector<16x12xbf16> to vector<16x12xf32>
      %169 = arith.addf %159, %168 : vector<16x12xf32>
      %170 = arith.truncf %169 : vector<16x12xf32> to vector<16x12xbf16>
      %c0_89 = arith.constant 0 : index
      %c0_90 = arith.constant 0 : index
      %171 = vector.load %arg21[%c0_89, %c0_90] : memref<16x12xbf16, #tpu.memory_space<vmem>>, vector<16x12xbf16>
      tpu.vector_store %arg21[%c0_89, %c0_90], %170 {strides = array<i32>} : memref<16x12xbf16, #tpu.memory_space<vmem>>, vector<16x12xbf16>,
    } else {
    }
    %c0 = arith.constant 0 : index
    %c0_1 = arith.constant 0 : index
    %c0_2 = arith.constant 0 : index
    %4 = vector.load %arg2[%c0, %c0_1, %c0_2] : memref<1x8x32xf32, #tpu.memory_space<vmem>>, vector<1x8x32xf32>
    %5 = vector.shape_cast %4 : vector<1x8x32xf32> to vector<8x32xf32>
    %6 = arith.truncf %5 : vector<8x32xf32> to vector<8x32xbf16>
    %c0_3 = arith.constant 0 : index
    %c0_4 = arith.constant 0 : index
    %7 = vector.load %arg8[%c0_3, %c0_4] : memref<32x16xbf16, #tpu.memory_space<vmem>>, vector<32x16xbf16>
    %cst = arith.constant dense<0.000000e+00> : vector<8x16xf32>
    %8 = tpu.matmul %6, %7, %cst {dimension_numbers = #tpu.dot_dimension_numbers<[1], [0], [0], [1], [0, 0, 1, 1], [], []>} : vector<8x32xbf16>, vector<32x16xbf16>, vector<8x16xf32> -> vector<8x16xf32>
    %c0_5 = arith.constant 0 : index
    %c0_6 = arith.constant 0 : index
    %c0_7 = arith.constant 0 : index
    %9 = vector.load %arg3[%c0_5, %c0_6, %c0_7] : memref<1x8x16xbf16, #tpu.memory_space<vmem>>, vector<1x8x16xbf16>
    %10 = vector.shape_cast %9 : vector<1x8x16xbf16> to vector<8x16xbf16>
    %11 = arith.extf %10 : vector<8x16xbf16> to vector<8x16xf32>
    %12 = arith.addf %8, %11 : vector<8x16xf32>
    %c0_8 = arith.constant 0 : index
    %c0_9 = arith.constant 0 : index
    %13 = vector.load %arg11[%c0_8, %c0_9] : memref<1x16xf32, #tpu.memory_space<vmem>>, vector<1x16xf32>
    %14 = vector.broadcast %13 : vector<1x16xf32> to vector<8x16xf32>
    %15 = arith.addf %12, %14 : vector<8x16xf32>
    %cst_10 = arith.constant 0.353553385 : f32
    %16 = vector.broadcast %cst_10 : f32 to vector<8x16xf32>
    %17 = arith.mulf %15, %16 : vector<8x16xf32>
    %18 = arith.truncf %17 : vector<8x16xf32> to vector<8x16xbf16>
    %c0_11 = arith.constant 0 : index
    %c0_12 = arith.constant 0 : index
    %19 = vector.load %arg12[%c0_11, %c0_12] : memref<1x16xf32, #tpu.memory_space<vmem>>, vector<1x16xf32>
    %20 = vector.broadcast %19 : vector<1x16xf32> to vector<8x16xf32>
    %21 = arith.addf %12, %20 : vector<8x16xf32>
    %cst_13 = arith.constant 0.353553385 : f32
    %22 = vector.broadcast %cst_13 : f32 to vector<8x16xf32>
    %23 = arith.mulf %21, %22 : vector<8x16xf32>
    %24 = arith.truncf %23 : vector<8x16xf32> to vector<8x16xbf16>
    %c0_i32_14 = arith.constant 0 : i32
    %25 = arith.subi %c0_i32_14, %0 : i32
    %26 = tpu.assume_multiple %25, 8 : i32
    %27 = tpu.iota {dimensions = array<i32: 0>} : vector<8x12xi32>
    %28 = vector.broadcast %0 : i32 to vector<8x12xi32>
    %29 = arith.addi %27, %28 : vector<8x12xi32>
    %30 = tpu.iota {dimensions = array<i32: 1>} : vector<8x12xi32>
    %c4_i32 = arith.constant 4 : i32
    %31 = vector.broadcast %c4_i32 : i32 to vector<8x12xi32>
    %32 = arith.addi %29, %31 : vector<8x12xi32>
    %33 = arith.cmpi sgt, %30, %32 : vector<8x12xi32>
    %c-996_i32 = arith.constant -996 : i32
    %34 = vector.broadcast %c-996_i32 : i32 to vector<8x12xi32>
    %35 = arith.addi %29, %34 : vector<8x12xi32>
    %36 = arith.cmpi sle, %30, %35 : vector<8x12xi32>
    %37 = arith.ori %33, %36 : vector<8x12xi1>
    %cst_15 = arith.constant -1.000000e+30 : f32
    %cst_16 = arith.constant 0.000000e+00 : f32
    %38 = vector.broadcast %cst_15 : f32 to vector<8x12xf32>
    %39 = vector.broadcast %cst_16 : f32 to vector<8x12xf32>
    %40 = arith.select %37, %38, %39 : vector<8x12xi1>, vector<8x12xf32>
    %c0_17 = arith.constant 0 : index
    %c0_18 = arith.constant 0 : index
    %41 = vector.load %arg20[%c0_17, %c0_18] : memref<16x12xbf16, #tpu.memory_space<vmem>>, vector<8x12xbf16>
    %42 = arith.index_cast %26 : i32 to index
    %c0_19 = arith.constant 0 : index
    %43 = vector.load %arg7[%42, %c0_19] : memref<128x16xbf16, #tpu.memory_space<vmem>>, vector<128x8xbf16>
    %44 = vector.extract_strided_slice %18 {offsets = [0, 0], sizes = [8, 8], strides = [1, 1]} : vector<8x16xbf16> to vector<8x8xbf16>
    %cst_20 = arith.constant dense<0.000000e+00> : vector<8x12xf32>
    %45 = tpu.matmul %44, %41, %cst_20 {dimension_numbers = #tpu.dot_dimension_numbers<[1], [0], [0], [1], [0, 0, 1, 1], [], []>} : vector<8x8xbf16>, vector<8x12xbf16>, vector<8x12xf32> -> vector<8x12xf32>
    %46 = vector.extract_strided_slice %24 {offsets = [0, 0], sizes = [8, 8], strides = [1, 1]} : vector<8x16xbf16> to vector<8x8xbf16>
    %cst_21 = arith.constant dense<0.000000e+00> : vector<8x128xf32>
    %47 = tpu.matmul %46, %43, %cst_21 {dimension_numbers = #tpu.dot_dimension_numbers<[1], [1], [0], [0], [0, 0, 1, 0], [], []>} : vector<8x8xbf16>, vector<128x8xbf16>, vector<8x128xf32> -> vector<8x128xf32>
    %c121_i32 = arith.constant 121 : i32
    %48 = tpu.dynamic_rotate %47 by %c121_i32 dim 1 {stride = 1 : si32, stride_dimension = 0 : si32} : vector<8x128xf32>, i32 -> vector<8x128xf32>
    %49 = vector.extract_strided_slice %48 {offsets = [0, 0], sizes = [8, 12], strides = [1, 1]} : vector<8x128xf32> to vector<8x12xf32>
    %50 = arith.addf %45, %49 : vector<8x12xf32>
    %51 = arith.addf %50, %40 : vector<8x12xf32>
    %cst_22 = arith.constant dense<0xFF800000> : vector<8xf32>
    %52 = vector.multi_reduction <maximumf>, %51, %cst_22 [1] : vector<8x12xf32> to vector<8xf32>
    %53 = vector.shape_cast %52 : vector<8xf32> to vector<8x1xf32>
    %54 = vector.broadcast %53 : vector<8x1xf32> to vector<8x12xf32>
    %55 = arith.subf %51, %54 : vector<8x12xf32>
    %56 = math.exp %55 : vector<8x12xf32>
    %cst_23 = arith.constant dense<0.000000e+00> : vector<8xf32>
    %57 = vector.multi_reduction <add>, %56, %cst_23 [1] : vector<8x12xf32> to vector<8xf32>
    %58 = vector.shape_cast %57 : vector<8xf32> to vector<8x1xf32>
    %59 = tpu.reciprocal %58 {approx = true} : vector<8x1xf32> -> vector<8x1xf32>
    %60 = vector.broadcast %59 : vector<8x1xf32> to vector<8x12xf32>
    %61 = arith.mulf %56, %60 : vector<8x12xf32>
    %62 = arith.truncf %61 : vector<8x12xf32> to vector<8x12xbf16>
    %c0_24 = arith.constant 0 : index
    %c0_25 = arith.constant 0 : index
    %63 = vector.load %arg21[%c0_24, %c0_25] : memref<16x12xbf16, #tpu.memory_space<vmem>>, vector<8x12xbf16>
    %cst_26 = arith.constant dense<0.000000e+00> : vector<8x8xf32>
    %64 = tpu.matmul %62, %63, %cst_26 {dimension_numbers = #tpu.dot_dimension_numbers<[1], [1], [0], [0], [0, 0, 1, 0], [], []>} : vector<8x12xbf16>, vector<8x12xbf16>, vector<8x8xf32> -> vector<8x8xf32>
    %65 = arith.truncf %64 : vector<8x8xf32> to vector<8x8xbf16>
    %c0_27 = arith.constant 0 : index
    %c0_28 = arith.constant 0 : index
    %66 = vector.load %arg22[%c0_27, %c0_28] : memref<8x16xbf16, #tpu.memory_space<vmem>>, vector<8x8xbf16>
    tpu.vector_store %arg22[%c0_27, %c0_28], %65 {strides = array<i32>} : memref<8x16xbf16, #tpu.memory_space<vmem>>, vector<8x8xbf16>,
    %c8 = arith.constant 8 : index
    %c0_29 = arith.constant 0 : index
    %67 = vector.load %arg20[%c8, %c0_29] : memref<16x12xbf16, #tpu.memory_space<vmem>>, vector<8x12xbf16>
    %68 = arith.index_cast %26 : i32 to index
    %c8_30 = arith.constant 8 : index
    %69 = vector.load %arg7[%68, %c8_30] : memref<128x16xbf16, #tpu.memory_space<vmem>>, vector<128x8xbf16>
    %70 = vector.extract_strided_slice %18 {offsets = [0, 8], sizes = [8, 8], strides = [1, 1]} : vector<8x16xbf16> to vector<8x8xbf16>
    %cst_31 = arith.constant dense<0.000000e+00> : vector<8x12xf32>
    %71 = tpu.matmul %70, %67, %cst_31 {dimension_numbers = #tpu.dot_dimension_numbers<[1], [0], [0], [1], [0, 0, 1, 1], [], []>} : vector<8x8xbf16>, vector<8x12xbf16>, vector<8x12xf32> -> vector<8x12xf32>
    %72 = vector.extract_strided_slice %24 {offsets = [0, 8], sizes = [8, 8], strides = [1, 1]} : vector<8x16xbf16> to vector<8x8xbf16>
    %cst_32 = arith.constant dense<0.000000e+00> : vector<8x128xf32>
    %73 = tpu.matmul %72, %69, %cst_32 {dimension_numbers = #tpu.dot_dimension_numbers<[1], [1], [0], [0], [0, 0, 1, 0], [], []>} : vector<8x8xbf16>, vector<128x8xbf16>, vector<8x128xf32> -> vector<8x128xf32>
    %c121_i32_33 = arith.constant 121 : i32
    %74 = tpu.dynamic_rotate %73 by %c121_i32_33 dim 1 {stride = 1 : si32, stride_dimension = 0 : si32} : vector<8x128xf32>, i32 -> vector<8x128xf32>
    %75 = vector.extract_strided_slice %74 {offsets = [0, 0], sizes = [8, 12], strides = [1, 1]} : vector<8x128xf32> to vector<8x12xf32>
    %76 = arith.addf %71, %75 : vector<8x12xf32>
    %77 = arith.addf %76, %40 : vector<8x12xf32>
    %cst_34 = arith.constant dense<0xFF800000> : vector<8xf32>
    %78 = vector.multi_reduction <maximumf>, %77, %cst_34 [1] : vector<8x12xf32> to vector<8xf32>
    %79 = vector.shape_cast %78 : vector<8xf32> to vector<8x1xf32>
    %80 = vector.broadcast %79 : vector<8x1xf32> to vector<8x12xf32>
    %81 = arith.subf %77, %80 : vector<8x12xf32>
    %82 = math.exp %81 : vector<8x12xf32>
    %cst_35 = arith.constant dense<0.000000e+00> : vector<8xf32>
    %83 = vector.multi_reduction <add>, %82, %cst_35 [1] : vector<8x12xf32> to vector<8xf32>
    %84 = vector.shape_cast %83 : vector<8xf32> to vector<8x1xf32>
    %85 = tpu.reciprocal %84 {approx = true} : vector<8x1xf32> -> vector<8x1xf32>
    %86 = vector.broadcast %85 : vector<8x1xf32> to vector<8x12xf32>
    %87 = arith.mulf %82, %86 : vector<8x12xf32>
    %88 = arith.truncf %87 : vector<8x12xf32> to vector<8x12xbf16>
    %c8_36 = arith.constant 8 : index
    %c0_37 = arith.constant 0 : index
    %89 = vector.load %arg21[%c8_36, %c0_37] : memref<16x12xbf16, #tpu.memory_space<vmem>>, vector<8x12xbf16>
    %cst_38 = arith.constant dense<0.000000e+00> : vector<8x8xf32>
    %90 = tpu.matmul %88, %89, %cst_38 {dimension_numbers = #tpu.dot_dimension_numbers<[1], [1], [0], [0], [0, 0, 1, 0], [], []>} : vector<8x12xbf16>, vector<8x12xbf16>, vector<8x8xf32> -> vector<8x8xf32>
    %91 = arith.truncf %90 : vector<8x8xf32> to vector<8x8xbf16>
    %c0_39 = arith.constant 0 : index
    %c8_40 = arith.constant 8 : index
    %92 = vector.load %arg22[%c0_39, %c8_40] : memref<8x16xbf16, #tpu.memory_space<vmem>>, vector<8x8xbf16>
    tpu.vector_store %arg22[%c0_39, %c8_40], %91 {strides = array<i32>} : memref<8x16xbf16, #tpu.memory_space<vmem>>, vector<8x8xbf16>,
    %c0_41 = arith.constant 0 : index
    %c0_42 = arith.constant 0 : index
    %93 = vector.load %arg22[%c0_41, %c0_42] : memref<8x16xbf16, #tpu.memory_space<vmem>>, vector<8x16xbf16>
    %c0_43 = arith.constant 0 : index
    %c0_44 = arith.constant 0 : index
    %94 = vector.load %arg13[%c0_43, %c0_44] : memref<16x32xbf16, #tpu.memory_space<vmem>>, vector<16x32xbf16>
    %cst_45 = arith.constant dense<0.000000e+00> : vector<8x32xf32>
    %95 = tpu.matmul %93, %94, %cst_45 {dimension_numbers = #tpu.dot_dimension_numbers<[1], [0], [0], [1], [0, 0, 1, 1], [], []>} : vector<8x16xbf16>, vector<16x32xbf16>, vector<8x32xf32> -> vector<8x32xf32>
    %c0_46 = arith.constant 0 : index
    %c0_47 = arith.constant 0 : index
    %96 = vector.load %arg14[%c0_46, %c0_47] : memref<1x32xf32, #tpu.memory_space<vmem>>, vector<1x32xf32>
    %97 = vector.broadcast %96 : vector<1x32xf32> to vector<8x32xf32>
    %98 = arith.addf %95, %97 : vector<8x32xf32>
    %99 = arith.addf %98, %5 : vector<8x32xf32>
    %cst_48 = arith.constant dense<0.000000e+00> : vector<8xf32>
    %100 = vector.multi_reduction <add>, %99, %cst_48 [1] : vector<8x32xf32> to vector<8xf32>
    %101 = vector.shape_cast %100 : vector<8xf32> to vector<8x1xf32>
    %cst_49 = arith.constant 3.200000e+01 : f32
    %102 = vector.broadcast %cst_49 : f32 to vector<8x1xf32>
    %103 = arith.divf %101, %102 : vector<8x1xf32>
    %104 = vector.broadcast %103 : vector<8x1xf32> to vector<8x32xf32>
    %105 = arith.subf %99, %104 : vector<8x32xf32>
    %106 = arith.mulf %105, %105 : vector<8x32xf32>
    %cst_50 = arith.constant dense<0.000000e+00> : vector<8xf32>
    %107 = vector.multi_reduction <add>, %106, %cst_50 [1] : vector<8x32xf32> to vector<8xf32>
    %108 = vector.shape_cast %107 : vector<8xf32> to vector<8x1xf32>
    %cst_51 = arith.constant 3.200000e+01 : f32
    %109 = vector.broadcast %cst_51 : f32 to vector<8x1xf32>
    %110 = arith.divf %108, %109 : vector<8x1xf32>
    %111 = vector.broadcast %103 : vector<8x1xf32> to vector<8x32xf32>
    %112 = arith.subf %99, %111 : vector<8x32xf32>
    %cst_52 = arith.constant 9.99999974E-6 : f32
    %113 = vector.broadcast %cst_52 : f32 to vector<8x1xf32>
    %114 = arith.addf %110, %113 : vector<8x1xf32>
    %115 = math.rsqrt %114 : vector<8x1xf32>
    %116 = vector.broadcast %115 : vector<8x1xf32> to vector<8x32xf32>
    %117 = arith.mulf %112, %116 : vector<8x32xf32>
    %118 = arith.truncf %117 : vector<8x32xf32> to vector<8x32xbf16>
    %c0_53 = arith.constant 0 : index
    %c0_54 = arith.constant 0 : index
    %119 = vector.load %arg15[%c0_53, %c0_54] : memref<32x64xbf16, #tpu.memory_space<vmem>>, vector<32x64xbf16>
    %cst_55 = arith.constant dense<0.000000e+00> : vector<8x64xf32>
    %120 = tpu.matmul %118, %119, %cst_55 {dimension_numbers = #tpu.dot_dimension_numbers<[1], [0], [0], [1], [0, 0, 1, 1], [], []>} : vector<8x32xbf16>, vector<32x64xbf16>, vector<8x64xf32> -> vector<8x64xf32>
    %c0_56 = arith.constant 0 : index
    %c0_57 = arith.constant 0 : index
    %121 = vector.load %arg16[%c0_56, %c0_57] : memref<1x64xf32, #tpu.memory_space<vmem>>, vector<1x64xf32>
    %122 = vector.broadcast %121 : vector<1x64xf32> to vector<8x64xf32>
    %123 = arith.addf %120, %122 : vector<8x64xf32>
    %cst_58 = arith.constant 0.000000e+00 : f32
    %124 = vector.broadcast %cst_58 : f32 to vector<8x64xf32>
    %125 = arith.maximumf %123, %124 : vector<8x64xf32>
    %126 = arith.truncf %125 : vector<8x64xf32> to vector<8x64xbf16>
    %c0_59 = arith.constant 0 : index
    %c0_60 = arith.constant 0 : index
    %127 = vector.load %arg17[%c0_59, %c0_60] : memref<64x32xbf16, #tpu.memory_space<vmem>>, vector<64x32xbf16>
    %cst_61 = arith.constant dense<0.000000e+00> : vector<8x32xf32>
    %128 = tpu.matmul %126, %127, %cst_61 {dimension_numbers = #tpu.dot_dimension_numbers<[1], [0], [0], [1], [0, 0, 1, 1], [], []>} : vector<8x64xbf16>, vector<64x32xbf16>, vector<8x32xf32> -> vector<8x32xf32>
    %c0_62 = arith.constant 0 : index
    %c0_63 = arith.constant 0 : index
    %129 = vector.load %arg18[%c0_62, %c0_63] : memref<1x32xf32, #tpu.memory_space<vmem>>, vector<1x32xf32>
    %130 = vector.broadcast %129 : vector<1x32xf32> to vector<8x32xf32>
    %131 = arith.addf %128, %130 : vector<8x32xf32>
    %132 = arith.addf %131, %117 : vector<8x32xf32>
    %cst_64 = arith.constant dense<0.000000e+00> : vector<8xf32>
    %133 = vector.multi_reduction <add>, %132, %cst_64 [1] : vector<8x32xf32> to vector<8xf32>
    %134 = vector.shape_cast %133 : vector<8xf32> to vector<8x1xf32>
    %cst_65 = arith.constant 3.200000e+01 : f32
    %135 = vector.broadcast %cst_65 : f32 to vector<8x1xf32>
    %136 = arith.divf %134, %135 : vector<8x1xf32>
    %137 = vector.broadcast %136 : vector<8x1xf32> to vector<8x32xf32>
    %138 = arith.subf %132, %137 : vector<8x32xf32>
    %139 = arith.mulf %138, %138 : vector<8x32xf32>
    %cst_66 = arith.constant dense<0.000000e+00> : vector<8xf32>
    %140 = vector.multi_reduction <add>, %139, %cst_66 [1] : vector<8x32xf32> to vector<8xf32>
    %141 = vector.shape_cast %140 : vector<8xf32> to vector<8x1xf32>
    %cst_67 = arith.constant 3.200000e+01 : f32
    %142 = vector.broadcast %cst_67 : f32 to vector<8x1xf32>
    %143 = arith.divf %141, %142 : vector<8x1xf32>
    %144 = vector.broadcast %136 : vector<8x1xf32> to vector<8x32xf32>
    %145 = arith.subf %132, %144 : vector<8x32xf32>
    %cst_68 = arith.constant 9.99999974E-6 : f32
    %146 = vector.broadcast %cst_68 : f32 to vector<8x1xf32>
    %147 = arith.addf %143, %146 : vector<8x1xf32>
    %148 = math.rsqrt %147 : vector<8x1xf32>
    %149 = vector.broadcast %148 : vector<8x1xf32> to vector<8x32xf32>
    %150 = arith.mulf %145, %149 : vector<8x32xf32>
    %c0_69 = arith.constant 0 : index
    %c0_70 = arith.constant 0 : index
    %c0_71 = arith.constant 0 : index
    %151 = vector.load %arg19[%c0_69, %c0_70, %c0_71] : memref<1x8x32xf32, #tpu.memory_space<vmem>>, vector<1x8x32xf32>
    %152 = vector.shape_cast %151 : vector<1x8x32xf32> to vector<8x32xf32>
    %153 = vector.shape_cast %150 : vector<8x32xf32> to vector<1x8x32xf32>
    tpu.vector_store %arg19[%c0_69, %c0_70, %c0_71], %153 {strides = array<i32>} : memref<1x8x32xf32, #tpu.memory_space<vmem>>, vector<1x8x32xf32>,
    return
  }
  func.func @transform_0(%arg0: i32, %arg1: i32) -> (i32, i32, i32) {
    %c0_i32 = arith.constant 0 : i32
    %c0_i32_0 = arith.constant 0 : i32
    return %arg0, %arg1, %c0_i32 : i32, i32, i32
  }
  func.func @transform_1(%arg0: i32, %arg1: i32) -> (i32, i32, i32) {
    %c0_i32 = arith.constant 0 : i32
    %c0_i32_0 = arith.constant 0 : i32
    return %arg0, %arg1, %c0_i32 : i32, i32, i32
  }
  func.func @transform_2(%arg0: i32, %arg1: i32) -> (i32, i32, i32) {
    %c0_i32 = arith.constant 0 : i32
    %c0_i32_0 = arith.constant 0 : i32
    %c0_i32_1 = arith.constant 0 : i32
    return %arg0, %c0_i32, %c0_i32_0 : i32, i32, i32
  }
  func.func @transform_3(%arg0: i32, %arg1: i32) -> (i32, i32, i32) {
    %c0_i32 = arith.constant 0 : i32
    %c0_i32_0 = arith.constant 0 : i32
    %c0_i32_1 = arith.constant 0 : i32
    return %arg0, %c0_i32, %c0_i32_0 : i32, i32, i32
  }
  func.func @transform_4(%arg0: i32, %arg1: i32) -> (i32, i32, i32) {
    %c0_i32 = arith.constant 0 : i32
    %c0_i32_0 = arith.constant 0 : i32
    %c0_i32_1 = arith.constant 0 : i32
    return %arg0, %c0_i32, %c0_i32_0 : i32, i32, i32
  }
  func.func @transform_5(%arg0: i32, %arg1: i32) -> (i32, i32) {
    %c0_i32 = arith.constant 0 : i32
    %c0_i32_0 = arith.constant 0 : i32
    %c0_i32_1 = arith.constant 0 : i32
    return %c0_i32, %c0_i32_0 : i32, i32
  }
  func.func @transform_6(%arg0: i32, %arg1: i32) -> (i32, i32) {
    %c0_i32 = arith.constant 0 : i32
    %c0_i32_0 = arith.constant 0 : i32
    %c0_i32_1 = arith.constant 0 : i32
    return %c0_i32, %c0_i32_0 : i32, i32
  }
  func.func @transform_7(%arg0: i32, %arg1: i32) -> (i32, i32) {
    %c0_i32 = arith.constant 0 : i32
    %c0_i32_0 = arith.constant 0 : i32
    %c0_i32_1 = arith.constant 0 : i32
    return %c0_i32, %c0_i32_0 : i32, i32
  }
  func.func @transform_8(%arg0: i32, %arg1: i32) -> (i32, i32) {
    %c0_i32 = arith.constant 0 : i32
    %c0_i32_0 = arith.constant 0 : i32
    %c0_i32_1 = arith.constant 0 : i32
    return %c0_i32, %c0_i32_0 : i32, i32
  }
  func.func @transform_9(%arg0: i32, %arg1: i32) -> (i32, i32) {
    %c0_i32 = arith.constant 0 : i32
    %c0_i32_0 = arith.constant 0 : i32
    %c0_i32_1 = arith.constant 0 : i32
    return %c0_i32, %c0_i32_0 : i32, i32
  }
  func.func @transform_10(%arg0: i32, %arg1: i32) -> (i32, i32) {
    %c0_i32 = arith.constant 0 : i32
    %c0_i32_0 = arith.constant 0 : i32
    %c0_i32_1 = arith.constant 0 : i32
    return %c0_i32, %c0_i32_0 : i32, i32
  }
  func.func @transform_11(%arg0: i32, %arg1: i32) -> (i32, i32) {
    %c0_i32 = arith.constant 0 : i32
    %c0_i32_0 = arith.constant 0 : i32
    %c0_i32_1 = arith.constant 0 : i32
    return %c0_i32, %c0_i32_0 : i32, i32
  }
  func.func @transform_12(%arg0: i32, %arg1: i32) -> (i32, i32) {
    %c0_i32 = arith.constant 0 : i32
    %c0_i32_0 = arith.constant 0 : i32
    %c0_i32_1 = arith.constant 0 : i32
    return %c0_i32, %c0_i32_0 : i32, i32
  }
  func.func @transform_13(%arg0: i32, %arg1: i32) -> (i32, i32) {
    %c0_i32 = arith.constant 0 : i32
    %c0_i32_0 = arith.constant 0 : i32
    %c0_i32_1 = arith.constant 0 : i32
    return %c0_i32, %c0_i32_0 : i32, i32
  }
  func.func @transform_14(%arg0: i32, %arg1: i32) -> (i32, i32) {
    %c0_i32 = arith.constant 0 : i32
    %c0_i32_0 = arith.constant 0 : i32
    %c0_i32_1 = arith.constant 0 : i32
    return %c0_i32, %c0_i32_0 : i32, i32
  }
  func.func @transform_15(%arg0: i32, %arg1: i32) -> (i32, i32) {
    %c0_i32 = arith.constant 0 : i32
    %c0_i32_0 = arith.constant 0 : i32
    %c0_i32_1 = arith.constant 0 : i32
    return %c0_i32, %c0_i32_0 : i32, i32
  }
  func.func @transform_16(%arg0: i32, %arg1: i32) -> (i32, i32) {
    %c0_i32 = arith.constant 0 : i32
    %c0_i32_0 = arith.constant 0 : i32
    %c0_i32_1 = arith.constant 0 : i32
    return %c0_i32, %c0_i32_0 : i32, i32
  }
  func.func @transform_17(%arg0: i32, %arg1: i32) -> (i32, i32, i32) {
    %c0_i32 = arith.constant 0 : i32
    %c0_i32_0 = arith.constant 0 : i32
    return %arg0, %arg1, %c0_i32 : i32, i32, i32
  }
}

</mosaic_0001>

<bundles_post_ra>
// kernel: tpu_custom_call.1
= control target key start
LH: loop header
LB: loop body
LE: loop exit
PB: predicated region body
PF: predicated region fallthrough
CT: control target
= control target key end

     0   :  { %s2647_s0 = inlined_call_operand.vmem [shape: f32[2,8,32], index: 0, kind: input, shape index: {}]   ;;  %s2648_s1 = inlined_call_operand.vmem [shape: bf16[2,8,16], index: 1, kind: input, shape index: {}]   ;;  %s2649_s2 = inlined_call_operand.vmem [shape: bf16[2,32,12], index: 2, kind: input, shape index: {}]   ;;  %s2650_s3 = inlined_call_operand.vmem [shape: bf16[2,16,12], index: 3, kind: input, shape index: {}]   ;;  %s2651_s4 = inlined_call_operand.vmem [shape: bf16[2,16,12], index: 4, kind: input, shape index: {}]   ;;  %s2652_s5 = inlined_call_operand.vmem [shape: bf16[128,16], index: 5, kind: input, shape index: {}]   ;;  %s2653_s6 = inlined_call_operand.vmem [shape: bf16[32,16], index: 6, kind: input, shape index: {}]   ;;  %s2654_s7 = inlined_call_operand.vmem [shape: bf16[16,32], index: 7, kind: input, shape index: {}]   ;;  %s2655_s8 = inlined_call_operand.vmem [shape: bf16[16,32], index: 8, kind: input, shape index: {}]   ;;  %s2656_s9 = inlined_call_operand.vmem [shape: f32[1,16], index: 9, kind: input, shape index: {}]   ;;  %s2657_s10 = inlined_call_operand.vmem [shape: f32[1,16], index: 10, kind: input, shape index: {}]   ;;  %s2658_s11 = inlined_call_operand.vmem [shape: bf16[16,32], index: 11, kind: input, shape index: {}]   ;;  %s2659_s12 = inlined_call_operand.vmem [shape: f32[1,32], index: 12, kind: input, shape index: {}]   ;;  %s2660_s13 = inlined_call_operand.vmem [shape: bf16[32,64], index: 13, kind: input, shape index: {}]   ;;  %s2661_s14 = inlined_call_operand.vmem [shape: f32[1,64], index: 14, kind: input, shape index: {}]   ;;  %s2662_s15 = inlined_call_operand.vmem [shape: bf16[64,32], index: 15, kind: input, shape index: {}]   ;;  %s2663_s16 = inlined_call_operand.vmem [shape: f32[1,32], index: 16, kind: input, shape index: {}]   ;;  %s2664_s17 = inlined_call_operand.hbm [shape: f32[2,8,32], index: 17, kind: output, shape index: {}]  }
   0x1   :  { %2672 = sst [smem:[#allocation15_spill]] %s2647_s0 }
   0x2   :  { %2673 = sst [smem:[#allocation16_spill]] %s2648_s1 }
   0x3   :  { %2674 = sst [smem:[#allocation17_spill]] %s2649_s2 }
   0x4   :  { %22 = vsyncpa [#allocation6], 0 }
   0x5   :  { %24 = vsyncpa [#allocation6 + $0x1], 0  ;;  %s2299_s24 = smov 0   ;;  %s2301_s25 = smov 0  }
   0x6   :  { %s2303_s26 = smov 0   ;;  %s2305_s27 = smov 0  }
   0x7   :  { %s2307_s28 = smov 0   ;;  %s2309_s29 = smov 0  }
   0x8 LB: > { %2675 = sst [smem:[#allocation8_spill]] %s2181_s24  ;;  %s1786_s0 = sadd.s32 4294967295, %s2201_s29   ;;  %s2201_s29 = sphi %s2309_s29, %s30_s29   ;;  %s2197_s28 = sphi %s2307_s28, %s2693_s28   ;;  %s2193_s27 = sphi %s2305_s27, %s2692_s27   ;;  %s2189_s26 = sphi %s2303_s26, %s2691_s26   ;;  %s2185_s25 = sphi %s2301_s25, %s2695_s25   ;;  %s2181_s24 = sphi %s2299_s24, %s2694_s24  }
   0x9   : > { %2676 = sst [smem:[#allocation9_spill]] %s2189_s26  ;;  %s1787_s30 = sadd.s32 4294967294, %s2201_s29  }
   0xa   : > { %2677 = sst [smem:[#allocation10_spill]] %s2197_s28  ;;  %s42_s18 = sadd.s32 1, %s2197_s28 }
   0xb   : > { %2678 = sst [smem:[#allocation11_spill]] %s2201_s29  ;;  %s437_s19 = sadd.s32 1, %s2189_s26 }
   0xc   : > { %p44_p0 = scmp.ge.s32.totalorder %s42_s18, 2  ;;  %p447_p1 = scmp.ne.s32.totalorder %s2189_s26, %s2185_s25 }
   0xd   : > { %p448_p2 = scmp.eq.s32.totalorder %s1786_s0, 1  ;;  %p453_p3 = scmp.ne.s32.totalorder %s2185_s25, %s2181_s24 }
   0xe   : > { %s2697_s18 = smov (%p44_p0, %s42_s18), 0  ;;  %p454_p5 = scmp.eq.s32.totalorder %s1787_s30, 1 }
   0xf   : > { %2679 = sst [smem:[#allocation12_spill]] %s2697_s18  ;;  %p2339_p4 = por %p448_p2, %p447_p1 }
  0x10   : > { %s432_s20 = ssub.s32 %s2197_s28, %s2697_s18  ;;  %p1790_p6 = scmp.ge.s32.totalorder %s2201_s29, 1 }
  0x11   : > { %p435_p7 = scmp.eq.s32.totalorder %s432_s20, 0  ;;  %p2346_p8 = por %p454_p5, %p453_p3 }
  0x12   : > { %p552_p9 = scmp.lt.s32.totalorder %s2201_s29, 3 }
  0x13   : > { %s2681_s21 = scalar_select %p2346_p8, 1, 0 }
  0x14   : > { %s2352_s22 = scalar_select %p435_p7, %s2189_s26, %s437_s19  }
  0x15   : > { %2682 = sst [smem:[#allocation13_spill]] %s2681_s21  ;;  %p553_p10 = pnand %p1790_p6, %p552_p9 }
  0x16   : > { %2683 = sst [smem:[#allocation14_spill]] %s2352_s22  ;;  %p628_p11 = scmp.lt.s32.totalorder (!%p553_p10), %s2193_s27, 1  ;;  %v2203_v0 = vmov (!%p553_p10), 0.0   ;;  %vm2204_vm0 = vmmov (!%p553_p10), 0   ;;  %v2084_v3 = vld [vmem:[%s2654_s7] sm:$0xff] (!%p553_p10)   ;;  %vm953_vm1 = vcmask (!%p553_p10), 64512  }
  0x17   : > { %556 = sbr.rel (%p553_p10) target bundleno = 3249 (0xcb1), region = 88  ;;  %1908 = vmatprep.subr.bf16.mxu0 (!%p553_p10), %v2203_v0  ;;  %1912 = vmatprep.mubr.msk.bf16.mxu0 (!%p553_p10), %vm2204_vm0, %v2203_v0  ;;  %s2684_s2 = sld [smem:[#allocation17_spill]] (!%p553_p10)  ;;  %v2088_v4 = vld [vmem:[%s2652_s5] sm:$0xff] (!%p553_p10)   ;;  %vm692_vm2 = vcmask (!%p553_p10), 261120   ;;  %v2086_v7 = vld [vmem:[%s2653_s6 + $0x8] sm:$0xff] (!%p553_p10)   ;;  %v2090_v13 = vld [vmem:[%s2652_s5 + $0x10] sm:$0xff] (!%p553_p10)  }
  0x18   : > { %1916 = vmatprep.subr.bf16.mxu1 (!%p553_p10), %v2203_v0  ;;  %1920 = vmatprep.mubr.msk.bf16.mxu1 (!%p553_p10), %vm2204_vm0, %v2203_v0  ;;  %s2685_s19 = sld [smem:[#allocation15_spill]] (!%p553_p10)  ;;  %v2087_v5 = vld [vmem:[%s2655_s8] sm:$0xff] (!%p553_p10)   ;;  %v958_v9 = vsel (!%p553_p10), %vm953_vm1, %v2088_v4, 0  ;;  %v2089_v11 = vld [vmem:[%s2652_s5 + $0x8] sm:$0xff] (!%p553_p10)   ;;  %v964_v14 = vsel (!%p553_p10), %vm953_vm1, %v2090_v13, 0  ;;  %v2091_v15 = vld [vmem:[%s2652_s5 + $0x18] sm:$0xff] (!%p553_p10)  }
  0x19   : > { %v2085_v6 = vld [vmem:[%s2653_s6] sm:$0xff] (!%p553_p10)   ;;  %v961_v12 = vsel (!%p553_p10), %vm953_vm1, %v2089_v11, 0  ;;  %v967_v16 = vsel (!%p553_p10), %vm953_vm1, %v2091_v15, 0  ;;  %v2093_v19 = vld [vmem:[%s2652_s5 + $0x28] sm:$0xff] (!%p553_p10)   ;;  %v2094_v21 = vld [vmem:[%s2652_s5 + $0x30] sm:$0xff] (!%p553_p10)   ;;  %s2686_s24 = sld [smem:[#allocation16_spill]] (!%p553_p10) }
  0x1a   : > { %v2092_v17 = vld [vmem:[%s2652_s5 + $0x20] sm:$0xff] (!%p553_p10)   ;;  %v973_v20 = vsel (!%p553_p10), %vm953_vm1, %v2093_v19, 0  ;;  %v976_v22 = vsel (!%p553_p10), %vm953_vm1, %v2094_v21, 0  ;;  %v2095_v23 = vld [vmem:[%s2652_s5 + $0x38] sm:$0xff] (!%p553_p10)   ;;  %vm738_vm3 = vcmask (!%p553_p10), 97280   ;;  %vm1028_vm4 = vcmask (!%p553_p10), 1043456  }
  0x1b   : > { %v970_v18 = vsel (!%p553_p10), %vm953_vm1, %v2092_v17, 0  ;;  %v979_v24 = vsel (!%p553_p10), %vm953_vm1, %v2095_v23, 0  ;;  %v1809_v48 = vld [vmem:[%s2656_s9] ss:$0 sm:$0xff] (!%p553_p10)  ;;  %v2103_v23 = vld [vmem:[%s2652_s5 + $0x28] sm:$0xff] (!%p553_p10)   ;;  %vm1134_vm6 = vcmask (!%p553_p10), 60416  }
  0x1c   : > { %v1810_v49 = vld [vmem:[%s2657_s10] ss:$0 sm:$0xff] (!%p553_p10)  ;;  %vm1403_vm7 = vcmask (!%p553_p10), 126016   ;;  %vm1421_vm8 = vcmask (!%p553_p10), 130048   ;;  %vm1588_vm9 = vcmask (!%p553_p10), 523264  }
  0x1d   : > { %v2096_v4 = vld [vmem:[%s2652_s5] sm:$0xff] (!%p553_p10)  }
  0x1e   : > { %s2359_s23 = scalar_select %p628_p11, %s2193_s27, 1 }
  0x20   : > { %s1851_s0 = sshll.u32 %s2359_s23, 4  ;;  %s2369_s18 = sshll.u32 %s2359_s23, 3 }
  0x21   : > { %s646_s20 = scalar_lea.vmem %s2684_s2, %s1851_s0  ;;  %s656_s30 = scalar_lea.vmem %s2651_s4, %s2369_s18 }
  0x22   : > { %v2082_v1 = vld [vmem:[%s646_s20] sm:$0xff]   ;;  %v2083_v2 = vld [vmem:[%s646_s20 + $0x8] sm:$0xff]   ;;  %s634_s20 = scalar_lea.vmem %s2685_s19, %s2369_s18  ;;  %s651_s28 = scalar_lea.vmem %s2650_s3, %s2369_s18 }
  0x23   : > { %1909 = vmatpush3.bf16.msra.mxu0 %v2082_v1  ;;  %1917 = vmatpush3.bf16.msra.mxu1 %v2082_v1  ;;  %v2394_v8 = vld [vmem:[%s634_s20] sm:$0xff]  ;;  %s1793_s26 = sshll.u32 %s2359_s23, 2  ;;  %s2205_s20 = smov 120  }
  0x24   : > { %1910 = vmatprep.subr.bf16.mxu0 %v2203_v0  ;;  %1918 = vmatprep.subr.bf16.mxu1 %v2203_v0  ;;  %v796_v10 = vpack.c.bf16 %v2394_v8, %v2394_v8  ;;  %v1860_v25 = vld [vmem:[%s656_s30] sm:$0xff]   ;;  %s641_s29 = scalar_lea.vmem %s2686_s24, %s1793_s26  ;;  %s2207_s24 = smov 8  }
  0x25   : > { %v1856_v26 = vld [vmem:[%s651_s28] sm:$0xff]   ;;  %v1861_v27 = vunpack.c.l.bf16 %v1860_v25  ;;  %v1862_v30 = vunpack.c.h.bf16 %v1860_v25  ;;  %1196 = vrot.lane.b32.xlu1 %v2096_v4, %s2205_s20  ;;  %s2206_s28 = smov 377   ;;  %s625_s30 = sand.u32 1, %s2185_s25  }
  0x26   : > { %v1857_v28 = vunpack.c.l.bf16 %v1856_v26  ;;  %v1858_v29 = vunpack.c.h.bf16 %v1856_v26  ;;  %v801_v37 = vld [vmem:[%s641_s29] sm:$0xf]  ;;  %s1791_s19 = sshll.u32 %s625_s30, 3  ;;  %s1848_s26 = sshll.u32 %s2193_s27, 7 }
  0x27   : > { %1911 = vmatpush3.bf16.msra.mxu0 %v2083_v2  ;;  %1919 = vmatpush3.bf16.msra.mxu1 %v2083_v2  ;;  %v802_v45 = vunpack.c.l.bf16 %v801_v37  ;;  %s627_s21 = scalar_lea.vmem [#allocation5], %s1791_s19  ;;  %s1648_s29 = scalar_lea.sflag [#allocation6], %s625_s30 }
  0x28   : > { %1924 = vmatprep.subr.bf16.mxu0 %v2203_v0  ;;  %1932 = vmatprep.subr.bf16.mxu1 %v2203_v0  ;;  %s1662_s2 = sshll.u32 %s627_s21, 4  ;;  %s2208_s27 = smov [#allocation5]   ;;  %s2601_s2 = int_to_ptr.vmem [resolvable:$true] %s1662_s2 }
  0x29   : > { %s2123_s18 = scalar_lea.vmem %s2601_s2, 128  ;;  %s2127_s23 = sshll.u32 %s2208_s27, 4  ;;  %s2128_s23 = int_to_ptr.vmem [resolvable:$false] %s2127_s23 }
  0x2a   : > { %1913 = vmatmul.mubr.msk.bf16.vlgmr.msra.gmra.mrb[0].mxu0 %vm692_vm2, %v2084_v3  ;;  %1921 = vmatmul.mubr.msk.bf16.vlgmr.msra.gmra.mrb[0].mxu1 %vm692_vm2, %v2087_v5  ;;  %p2124_p12 = scmp.ne.s32.totalorder %s2601_s2, %s2123_s18  ;;  %s2129_s22 = scalar_lea.vmem %s2128_s23, 256 }
  0x2b   : > { %1925 = vmatpush3.bf16.msra.mxu0 %v2085_v6  ;;  %1928 = vmatprep.mubr.msk.bf16.mxu0 %vm2204_vm0, %v2203_v0  ;;  %p2130_p1 = scmp.lt.s32.totalorder %s2601_s2, %s2128_s23  ;;  %p2131_p2 = scmp.lt.s32.totalorder %s2129_s22, %s2123_s18 }
  0x2c   : > { %1926 = vmatprep.subr.bf16.mxu0 %v2203_v0  ;;  %1948 = vmatprep.mubr.msk.bf16.mxu1 %vm2204_vm0, %v2203_v0  ;;  %p2125_p13 = pnand %p2124_p12, %p2339_p4 }
  0x2d   : > { %p2132_p3 = por %p2131_p2, %p2130_p1 }
  0x2e   : > { %p2126_p0 = pneg %p2125_p13 }
  0x2f   : > { %1927 = vmatpush3.bf16.msra.mxu0 %v2086_v7 }
  0x30   : > { %1933 = vmatpush3.bf16.xpose.msra.mxu1 %v958_v9  ;;  %1952 = vmatprep.subr.bf16.mxu0 %v2203_v0  ;;  %p2133_p5 = pnand %p2132_p3, %p2126_p0 }
  0x31   : > { %1934 = vmatprep.subr.bf16.mxu1 %v2203_v0 }
  0x32   : > { %1929 = vmatmul.mubr.msk.bf16.vlgmr.msra.gmra.mrb[4].mxu0 %vm692_vm2, %v796_v10 }
  0x33   : > { %1954 = vmatprep.mubr.msk.bf16.mxu0 %vm2204_vm0, %v2203_v0 }
  0x38   : > { %1935 = vmatpush3.bf16.xpose.msra.mxu1 %v961_v12 }
  0x39   : > { %1936 = vmatprep.subr.bf16.mxu1 %v2203_v0 }
  0x40   : > { %1937 = vmatpush3.bf16.xpose.msra.mxu1 %v964_v14  ;;  %v880_v14 = vlaneseq }
  0x41   : > { %1938 = vmatprep.subr.bf16.mxu1 %v2203_v0 }
  0x42   : > { %v881_v15 = vshrl.u32 %v880_v14, 7 }
  0x44   : > { %v886_v17 = vadd.s32 4, %v881_v15 }
  0x48   : > { %1939 = vmatpush3.bf16.xpose.msra.mxu1 %v967_v16  ;;  %v885_v16 = vand.u32 127, %v880_v14 }
  0x49   : > { %1940 = vmatprep.subr.bf16.mxu1 %v2203_v0 }
  0x4a   : > { %vm887_vm5 = vcmp.gt.s32.totalorder %v885_v16, %v886_v17 }
  0x4b   : > { %v2482_v19 = vsel %vm887_vm5, -1e+30, %v2203_v0 }
  0x50   : > { %1941 = vmatpush3.bf16.xpose.msra.mxu1 %v970_v18 }
  0x51   : > { %1942 = vmatprep.subr.bf16.mxu1 %v2203_v0 }
  0x58   : > { %1943 = vmatpush3.bf16.xpose.msra.mxu1 %v973_v20 }
  0x59   : > { %1944 = vmatprep.subr.bf16.mxu1 %v2203_v0 }
  0x60   : > { %1945 = vmatpush3.bf16.xpose.msra.mxu1 %v976_v22 }
  0x61   : > { %1946 = vmatprep.subr.bf16.mxu1 %v2203_v0 }
  0x68   : > { %1947 = vmatpush3.bf16.xpose.msra.mxu1 %v979_v24 }
  0x69   : > { %1984 = vmatprep.subr.bf16.mxu1 %v2203_v0 }
  0xfd   : > { %v730_v31 = vpop.f32.mrb[0].mxu0  ;;  %v786_v32 = vpop.f32.mrb[0].mxu1 }
  0xfe   : > { %v1914_v33 = vpop.f32.mrb[1].mxu0  ;;  %v787_v34 = vadd.f32 %v1861_v27, %v786_v32  ;;  %v1922_v35 = vpop.f32.mrb[1].mxu1  ;;  %v731_v39 = vadd.f32 %v1857_v28, %v730_v31  ;;  %v2099_v31 = vld [vmem:[%s2652_s5 + $0x18] sm:$0xff]   ;;  %v2100_v32 = vld [vmem:[%s2652_s5 + $0x20] sm:$0xff]  }
  0xff   : > { %v733_v36 = vpop.f32.mrb[2].mxu0  ;;  %v789_v38 = vpop.f32.mrb[2].mxu1  ;;  %v2101_v33 = vld [vmem:[%s2652_s5 + $0x30] sm:$0xff]  }
 0x100   : > { %v734_v40 = vadd.f32 %v1858_v29, %v733_v36  ;;  %v1915_v41 = vpop.f32.mrb[3].mxu0  ;;  %v790_v42 = vadd.f32 %v1862_v30, %v789_v38  ;;  %v1923_v43 = vpop.f32.mrb[3].mxu1  ;;  %v2097_v29 = vld [vmem:[%s2652_s5 + $0x8] sm:$0xff]   ;;  %v2098_v30 = vld [vmem:[%s2652_s5 + $0x10] sm:$0xff]  }
 0x101   : > { %v1197_v35 = vpop.permute.xlu1 %1196 }
 0x102   : > { %v737_v44 = vpack.c.bf16 %v734_v40, %v731_v39  ;;  %v793_v46 = vpack.c.bf16 %v790_v42, %v787_v34  ;;  %v2102_v34 = vld [vmem:[%s2652_s5 + $0x38] sm:$0xff]   ;;  %v1216_v43 = vsel %vm953_vm1, %v1197_v35, 0 }
 0x104   : > { %739 = vst.msk [vmem:[#allocation2] sm:$0xff] %vm738_vm3, %v737_v44  ;;  %794 = vst.msk [vmem:[#allocation3] sm:$0xff] %vm738_vm3, %v793_v46 }
 0x105   : > { %v853_v47 = vpop.f32.mrb[4].mxu0 }
 0x106   : > { %v854_v50 = vadd.f32 %v853_v47, %v802_v45  ;;  %v1930_v51 = vpop.f32.mrb[5].mxu0 }
 0x107   : > { %v856_v52 = vpop.f32.mrb[6].mxu0 }
 0x108   : > { %v866_v53 = vadd.f32 %v1809_v48, %v854_v50  ;;  %v876_v54 = vadd.f32 %v1810_v49, %v854_v50  ;;  %v1931_v55 = vpop.f32.mrb[7].mxu0 }
 0x10a   : > { %v867_v56 = vmul.f32 0.35355338, %v866_v53  ;;  %v877_v57 = vmul.f32 0.35355338, %v876_v54 }
 0x10b   : > { %v892_v58 = vld [vmem:[#allocation2] sm:$0xf]  ;;  %v1136_v59 = vld [vmem:[#allocation2] sm:$0xf0]  ;;  %v1086_v2 = vld [vmem:[#allocation3] sm:$0xf] }
 0x10c   : > { %v878_v60 = vpack.c.bf16 %v877_v57, %v877_v57  ;;  %v1030_v61 = vsel %vm1028_vm4, %v892_v58, 0  ;;  %v1287_v62 = vrot.slane %v1136_v59, 4  ;;  %v868_v63 = vpack.c.bf16 %v867_v56, %v867_v56  ;;  %v1347_v48 = vld [vmem:[#allocation3] sm:$0xf0] }
 0x10d   : > { %1953 = vmatpush3.bf16.msra.mxu0 %v1030_v61  ;;  %v1091_v3 = vsel %vm738_vm3, %v1086_v2, 0  ;;  %v1349_v50 = vrot.slane %v1347_v48, 4 }
 0x10e   : > { %1949 = vmatmul.mubr.msk.bf16.vlgmr.msra.gmra.mrb[4].mxu1 %vm953_vm1, %v878_v60  ;;  %v1292_v1 = vsel %vm1028_vm4, %v1287_v62, 0  ;;  %1958 = vmatprep.subr.bf16.mxu0 %v2203_v0 }
 0x10f   : > { %1985 = vmatpush3.bf16.msra.mxu1 %v1292_v1  ;;  %1986 = vmatprep.mubr.msk.bf16.mxu1 %vm2204_vm0, %v2203_v0  ;;  %v1354_v53 = vsel %vm738_vm3, %v1349_v50, 0 }
 0x110   : > { %1955 = vmatmul.mubr.msk.bf16.vlgmr.msra.gmra.mrb[8].mxu0 %vm953_vm1, %v868_v63  ;;  %1990 = vmatprep.subr.bf16.mxu1 %v2203_v0 }
 0x111   : > { %1960 = vmatprep.mubr.msk.bf16.mxu0 %vm2204_vm0, %v2203_v0 }
 0x116   : > { %1959 = vmatpush3.bf16.xpose.msra.mxu0 %v1091_v3 }
 0x117   : > { %1964 = vmatprep.subr.bf16.mxu0 %v2203_v0 }
 0x1e1   : > { %v1015_v5 = vpop.f32.mrb[4].mxu1 }
 0x1e2   : > { %1023 = vrot.lane.b32.xlu0 %v1015_v5, %s2206_s28  ;;  %v1950_v6 = vpop.f32.mrb[5].mxu1 }
 0x1e3   : > { %v1018_v7 = vpop.f32.mrb[6].mxu1  ;;  %v1066_v9 = vpop.f32.mrb[8].mxu0 }
 0x1e4   : > { %v1951_v10 = vpop.f32.mrb[7].mxu1  ;;  %v1956_v11 = vpop.f32.mrb[9].mxu0 }
 0x1e5   : > { %v1069_v12 = vpop.f32.mrb[10].mxu0 }
 0x1e6   : > { %v1957_v13 = vpop.f32.mrb[11].mxu0 }
 0x254   : > { %v1024_v18 = vpop.permute.xlu0 %1023 }
 0x255   : > { %v1067_v20 = vadd.f32 %v1066_v9, %v1024_v18 }
 0x257   : > { %v1072_v21 = vadd.f32 %v1067_v20, %v2482_v19 }
 0x259   : > { %v1074_v22 = vsel %vm738_vm3, %v1072_v21, -inf }
 0x25a   : > { %1075 = vmax.xlane.f32.xlu0 %v1074_v22 }
 0x270   : > { %1206 = vrot.lane.b32.xlu0 %v2103_v23, %s2205_s20 }
 0x2e7   : > { %v1076_v24 = vpop.xlane.xlu0 %1075 }
 0x2e8   : > { %v1077_v25 = vsub.f32 %v1072_v21, %v1076_v24 }
 0x2ea   : > { %v1078_v26 = vmul.f32 1.442695, %v1077_v25 }
 0x2eb   : > { %v1207_v56 = vpop.permute.xlu0 %1206 }
 0x2ec   : > { %2111 = vpow2.f32 %v1078_v26  ;;  %v1231_v57 = vsel %vm953_vm1, %v1207_v56, 0  ;;  %v1837_v56 = vld [vmem:[%s2661_s14] ss:$0 sm:$0xff] }
 0x2f6   : > { %v2112_v27 = vpop.eup %2111 }
 0x2f7   : > { %v1080_v28 = vsel %vm738_vm3, %v2112_v27, 0.0 }
 0x2f8   : > { %1081 = vadd.xlane.f32.xlu1 %v1080_v28 }
 0x309   : > { %1198 = vrot.lane.b32.xlu1 %v2097_v29, %s2205_s20 }
 0x30d   : > { %1200 = vrot.lane.b32.xlu1 %v2098_v30, %s2205_s20 }
 0x311   : > { %1202 = vrot.lane.b32.xlu1 %v2099_v31, %s2205_s20 }
 0x315   : > { %1204 = vrot.lane.b32.xlu1 %v2100_v32, %s2205_s20  ;;  %v1834_v32 = vld [vmem:[%s2659_s12] ss:$0 sm:$0xff] }
 0x319   : > { %1208 = vrot.lane.b32.xlu1 %v2101_v33, %s2205_s20 }
 0x31d   : > { %1210 = vrot.lane.b32.xlu1 %v2102_v34, %s2205_s20 }
 0x321   : > { %1154 = vrot.lane.b32.xlu1 %v878_v60, %s2205_s20 }
 0x325   : > { %1284 = vrot.lane.b32.xlu1 %v868_v63, %s2205_s20 }
 0x385   : > { %v1082_v36 = vpop.xlane.xlu1 %1081 }
 0x386   : > { %2113 = vrcp.f32 %v1082_v36 }
 0x389   : > { %v1199_v37 = vpop.permute.xlu1 %1198 }
 0x38a   : > { %v1219_v46 = vsel %vm953_vm1, %v1199_v37, 0 }
 0x38d   : > { %v1201_v38 = vpop.permute.xlu1 %1200 }
 0x38e   : > { %v1222_v51 = vsel %vm953_vm1, %v1201_v38, 0 }
 0x390   : > { %v2114_v39 = vpop.eup %2113 }
 0x391   : > { %v1084_v40 = vmul.f32 %v2114_v39, %v2112_v27  ;;  %v1203_v41 = vpop.permute.xlu1 %1202 }
 0x392   : > { %v1225_v54 = vsel %vm953_vm1, %v1203_v41, 0 }
 0x393   : > { %v1085_v42 = vpack.c.bf16 %v1084_v40, %v1084_v40 }
 0x395   : > { %1961 = vmatmul.mubr.msk.bf16.vlgmr.msra.gmra.mrb[12].mxu0 %vm738_vm3, %v1085_v42  ;;  %v1205_v44 = vpop.permute.xlu1 %1204 }
 0x396   : > { %1965 = vmatpush3.bf16.xpose.msra.mxu0 %v1216_v43  ;;  %1980 = vmatprep.mubr.msk.bf16.mxu0 %vm2204_vm0, %v2203_v0  ;;  %v1228_v55 = vsel %vm953_vm1, %v1205_v44, 0 }
 0x397   : > { %1966 = vmatprep.subr.bf16.mxu0 %v2203_v0 }
 0x399   : > { %v1209_v45 = vpop.permute.xlu1 %1208 }
 0x39a   : > { %v1234_v58 = vsel %vm953_vm1, %v1209_v45, 0  ;;  %v2105_v45 = vld [vmem:[%s2660_s13] sm:$0xff]  }
 0x39d   : > { %v1211_v47 = vpop.permute.xlu1 %1210 }
 0x39e   : > { %1967 = vmatpush3.bf16.xpose.msra.mxu0 %v1219_v46  ;;  %v1237_v59 = vsel %vm953_vm1, %v1211_v47, 0  ;;  %v2107_v46 = vld [vmem:[%s2662_s15] sm:$0xff]   ;;  %v2108_v47 = vld [vmem:[%s2662_s15 + $0x8] sm:$0xff]  }
 0x39f   : > { %1968 = vmatprep.subr.bf16.mxu0 %v2203_v0 }
 0x3a1   : > { %v1155_v49 = vpop.permute.xlu1 %1154 }
 0x3a5   : > { %v1285_v52 = vpop.permute.xlu1 %1284 }
 0x3a6   : > { %1969 = vmatpush3.bf16.xpose.msra.mxu0 %v1222_v51  ;;  %1987 = vmatmul.mubr.msk.bf16.vlgmr.msra.gmra.mrb[8].mxu1 %vm953_vm1, %v1285_v52 }
 0x3a7   : > { %1991 = vmatpush3.bf16.xpose.msra.mxu1 %v1354_v53  ;;  %1970 = vmatprep.subr.bf16.mxu0 %v2203_v0 }
 0x3a8   : > { %1992 = vmatprep.mubr.msk.bf16.mxu1 %vm2204_vm0, %v2203_v0  ;;  %1996 = vmatprep.subr.bf16.mxu1 %v2203_v0 }
 0x3ae   : > { %1971 = vmatpush3.bf16.xpose.msra.mxu0 %v1225_v54  ;;  %v2109_v54 = vld [vmem:[%s2662_s15 + $0x10] sm:$0xff]  }
 0x3af   : > { %1972 = vmatprep.subr.bf16.mxu0 %v2203_v0 }
 0x3b6   : > { %1973 = vmatpush3.bf16.xpose.msra.mxu0 %v1228_v55  ;;  %v2110_v55 = vld [vmem:[%s2662_s15 + $0x18] sm:$0xff]  }
 0x3b7   : > { %1974 = vmatprep.subr.bf16.mxu0 %v2203_v0 }
 0x3be   : > { %1975 = vmatpush3.bf16.xpose.msra.mxu0 %v1231_v57 }
 0x3bf   : > { %1976 = vmatprep.subr.bf16.mxu0 %v2203_v0 }
 0x3c6   : > { %1977 = vmatpush3.bf16.xpose.msra.mxu0 %v1234_v58 }
 0x3c7   : > { %1978 = vmatprep.subr.bf16.mxu0 %v2203_v0 }
 0x3ce   : > { %1979 = vmatpush3.bf16.xpose.msra.mxu0 %v1237_v59 }
 0x3cf   : > { %2002 = vmatprep.subr.bf16.mxu0 %v2203_v0 }
 0x3d5   : > { %1981 = vmatmul.mubr.msk.bf16.vlgmr.msra.gmra.mrb[16].mxu0 %vm953_vm1, %v1155_v49 }
 0x3d6   : > { %2006 = vmatprep.mubr.msk.bf16.mxu0 %vm2204_vm0, %v2203_v0  ;;  %2003 = vmatpush3.bf16.msra.mxu0 %v2105_v45 }
 0x3d7   : > { %2004 = vmatprep.subr.bf16.mxu0 %v2203_v0 }
 0x468   : > { %v1127_v60 = vpop.f32.mrb[12].mxu0 }
 0x469   : > { %v1133_v61 = vpack.c.bf16 %v1127_v60, %v1127_v60  ;;  %v1962_v62 = vpop.f32.mrb[13].mxu0 }
 0x46a   : > { %v1130_v63 = vpop.f32.mrb[14].mxu0 }
 0x46b   : > { %1135 = vst.msk [vmem:[#allocation4] sm:$0xf] %vm1134_vm6, %v1133_v61  ;;  %v1963_v1 = vpop.f32.mrb[15].mxu0 }
 0x479   : > { %v1328_v2 = vpop.f32.mrb[8].mxu1 }
 0x47a   : > { %v1988_v3 = vpop.f32.mrb[9].mxu1 }
 0x47b   : > { %v1331_v4 = vpop.f32.mrb[10].mxu1 }
 0x47c   : > { %v1989_v5 = vpop.f32.mrb[11].mxu1 }
 0x4a8   : > { %v1273_v6 = vpop.f32.mrb[16].mxu0 }
 0x4a9   : > { %1281 = vrot.lane.b32.xlu1 %v1273_v6, %s2206_s28  ;;  %v1982_v7 = vpop.f32.mrb[17].mxu0 }
 0x4aa   : > { %v1276_v9 = vpop.f32.mrb[18].mxu0 }
 0x4ab   : > { %v1983_v10 = vpop.f32.mrb[19].mxu0 }
 0x51b   : > { %v1282_v11 = vpop.permute.xlu1 %1281 }
 0x51c   : > { %v1329_v12 = vadd.f32 %v1328_v2, %v1282_v11 }
 0x51e   : > { %v1334_v13 = vadd.f32 %v1329_v12, %v2482_v19  ;;  %v2104_v19 = vld [vmem:[%s2658_s11] sm:$0xff]  }
 0x520   : > { %v1335_v14 = vsel %vm738_vm3, %v1334_v13, -inf }
 0x521   : > { %1336 = vmax.xlane.f32.xlu0 %v1335_v14 }
 0x5ae   : > { %v1337_v15 = vpop.xlane.xlu0 %1336 }
 0x5af   : > { %v1338_v16 = vsub.f32 %v1334_v13, %v1337_v15 }
 0x5b1   : > { %v1339_v17 = vmul.f32 1.442695, %v1338_v16 }
 0x5b3   : > { %2115 = vpow2.f32 %v1339_v17 }
 0x5bd   : > { %v2116_v18 = vpop.eup %2115 }
 0x5be   : > { %v1341_v20 = vsel %vm738_vm3, %v2116_v18, 0.0 }
 0x5bf   : > { %1342 = vadd.xlane.f32.xlu1 %v1341_v20 }
 0x64c   : > { %v1343_v21 = vpop.xlane.xlu1 %1342 }
 0x64d   : > { %2117 = vrcp.f32 %v1343_v21 }
 0x657   : > { %v2118_v22 = vpop.eup %2117 }
 0x658   : > { %v1345_v23 = vmul.f32 %v2118_v22, %v2116_v18 }
 0x65a   : > { %v1346_v24 = vpack.c.bf16 %v1345_v23, %v1345_v23 }
 0x65c   : > { %1993 = vmatmul.mubr.msk.bf16.vlgmr.msra.gmra.mrb[12].mxu1 %vm738_vm3, %v1346_v24 }
 0x65d   : > { %1998 = vmatprep.mubr.msk.bf16.mxu1 %vm2204_vm0, %v2203_v0  ;;  %1997 = vmatpush3.bf16.msra.mxu1 %v2104_v19 }
 0x65e   : > { %2010 = vmatprep.subr.bf16.mxu1 %v2203_v0 }
 0x72f   : > { %v1390_v25 = vpop.f32.mrb[12].mxu1 }
 0x730   : > { %v1854_v26 = vpack.c.bf16 %v1390_v25, %v1390_v25  ;;  %v1994_v27 = vpop.f32.mrb[13].mxu1 }
 0x731   : > { %v1393_v28 = vpop.f32.mrb[14].mxu1 }
 0x732   : > { %1400 = vrot.lane.b32.xlu0 %v1854_v26, %s2207_s24  ;;  %v1995_v29 = vpop.f32.mrb[15].mxu1  ;;  %s2599_s24 = scalar_lea.hbm %s2664_s17, %s1848_s26 }
 0x7a4   : > { %v1401_v30 = vpop.permute.xlu0 %1400 }
 0x7a5   : > { %1404 = vst.msk [vmem:[#allocation4] sm:$0xf] %vm1403_vm7, %v1401_v30 }
 0x7ac   : > { %v1405_v31 = vld [vmem:[#allocation4] sm:$0xf] }
 0x7ad   : > { %1999 = vmatmul.mubr.msk.bf16.vlgmr.msra.gmra.mrb[16].mxu1 %vm1421_vm8, %v1405_v31 }
 0x7ae   : > { %2018 = vmatprep.mubr.msk.bf16.mxu1 %vm2204_vm0, %v2203_v0  ;;  %2011 = vmatpush3.bf16.msra.mxu1 %v2107_v46 }
 0x7af   : > { %2012 = vmatprep.subr.bf16.mxu1 %v2203_v0 }
 0x7b2   : > { %2013 = vmatpush3.bf16.msra.mxu1 %v2108_v47 }
 0x7b3   : > { %2014 = vmatprep.subr.bf16.mxu1 %v2203_v0 }
 0x7b6   : > { %2015 = vmatpush3.bf16.msra.mxu1 %v2109_v54 }
 0x7b7   : > { %2016 = vmatprep.subr.bf16.mxu1 %v2203_v0  ;;  %v1841_v0 = vld [vmem:[%s2663_s16] ss:$0 sm:$0xff] }
 0x7ba   : > { %2017 = vmatpush3.bf16.msra.mxu1 %v2110_v55 }
 0x880   : > { %v1459_v33 = vpop.f32.mrb[16].mxu1 }
 0x881   : > { %v1460_v34 = vadd.f32 %v1834_v32, %v1459_v33  ;;  %v2000_v35 = vpop.f32.mrb[17].mxu1 }
 0x882   : > { %v1462_v36 = vpop.f32.mrb[18].mxu1 }
 0x883   : > { %v2001_v37 = vpop.f32.mrb[19].mxu1  ;;  %v1465_v38 = vadd.f32 %v1460_v34, %v2394_v8  ;;  %v2106_v8 = vld [vmem:[%s2660_s13 + $0x8] sm:$0xff]  }
 0x884   : > { %2005 = vmatpush3.bf16.msra.mxu0 %v2106_v8 }
 0x885   : > { %v1466_v39 = vsel %vm692_vm2, %v1465_v38, 0.0 }
 0x886   : > { %1467 = vadd.xlane.f32.xlu1 %v1466_v39 }
 0x913   : > { %v1468_v40 = vpop.xlane.xlu1 %1467 }
 0x914   : > { %v1470_v41 = vmul.f32 0.03125, %v1468_v40 }
 0x916   : > { %v1471_v42 = vsub.f32 %v1465_v38, %v1470_v41 }
 0x918   : > { %v1472_v43 = vmul.f32 %v1471_v42, %v1471_v42 }
 0x91a   : > { %v1473_v44 = vsel %vm692_vm2, %v1472_v43, 0.0 }
 0x91b   : > { %1474 = vadd.xlane.f32.xlu1 %v1473_v44 }
 0x9a8   : > { %v1475_v48 = vpop.xlane.xlu1 %1474 }
 0x9a9   : > { %v1476_v49 = vmul.f32 0.03125, %v1475_v48 }
 0x9ab   : > { %v1477_v50 = vadd.f32 1e-05, %v1476_v49 }
 0x9ad   : > { %2119 = vrsqrt.f32 %v1477_v50 }
 0x9b7   : > { %v2120_v51 = vpop.eup %2119 }
 0x9b8   : > { %v1479_v52 = vmul.f32 %v2120_v51, %v1471_v42 }
 0x9ba   : > { %v1480_v53 = vpack.c.bf16 %v1479_v52, %v1479_v52 }
 0x9bc   : > { %2007 = vmatmul.mubr.msk.bf16.vlgmr.msra.gmra.mrb[20].mxu0 %vm692_vm2, %v1480_v53 }
 0xa8f   : > { %v1541_v57 = vpop.f32.mrb[20].mxu0 }
 0xa90   : > { %v1542_v58 = vadd.f32 %v1837_v56, %v1541_v57  ;;  %v2008_v59 = vpop.f32.mrb[21].mxu0 }
 0xa91   : > { %v1544_v60 = vpop.f32.mrb[22].mxu0 }
 0xa92   : > { %v1547_v61 = vmax.f32 %v1542_v58, 0.0  ;;  %v2009_v62 = vpop.f32.mrb[23].mxu0 }
 0xa94   : > { %v1548_v63 = vpack.c.bf16 %v1547_v61, %v1547_v61 }
 0xa96   : > { %2019 = vmatmul.mubr.msk.bf16.vlgmr.msra.gmra.mrb[20].mxu1 %vm1588_vm9, %v1548_v63 }
 0xb69   : > { %v1626_v1 = vpop.f32.mrb[20].mxu1 }
 0xb6a   : > { %v1627_v2 = vadd.f32 %v1841_v0, %v1626_v1  ;;  %v2020_v3 = vpop.f32.mrb[21].mxu1 }
 0xb6b   : > { %v1629_v4 = vpop.f32.mrb[22].mxu1 }
 0xb6c   : > { %v2021_v5 = vpop.f32.mrb[23].mxu1  ;;  %v1632_v6 = vadd.f32 %v1627_v2, %v1479_v52 }
 0xb6e   : > { %v1633_v7 = vsel %vm692_vm2, %v1632_v6, 0.0 }
 0xb6f   : > { %1634 = vadd.xlane.f32.xlu1 %v1633_v7 }
 0xbfc   : > { %v1635_v9 = vpop.xlane.xlu1 %1634 }
 0xbfd   : > { %v1636_v10 = vmul.f32 0.03125, %v1635_v9 }
 0xbff   : > { %v1637_v11 = vsub.f32 %v1632_v6, %v1636_v10 }
 0xc01   : > { %v1638_v12 = vmul.f32 %v1637_v11, %v1637_v11 }
 0xc03   : > { %v1639_v13 = vsel %vm692_vm2, %v1638_v12, 0.0 }
 0xc04   : > { %1640 = vadd.xlane.f32.xlu1 %v1639_v13 }
 0xc91   : > { %v1641_v14 = vpop.xlane.xlu1 %1640 }
 0xc92   : > { %v1642_v15 = vmul.f32 0.03125, %v1641_v14 }
 0xc94   : > { %v1643_v16 = vadd.f32 1e-05, %v1642_v15 }
 0xc96   : > { %2121 = vrsqrt.f32 %v1643_v16 }
 0xca0   : > { %v2122_v17 = vpop.eup %2121 }
 0xca1   : > { %v1645_v18 = vmul.f32 %v2122_v17, %v1637_v11 }
 0xca3   : > { %1646 = vst.msk [vmem:[%s627_s21] sm:$0xff] %vm692_vm2, %v1645_v18 }
 0xca4   : > { %2136 = shalt.err (!%p2133_p5)
}
 0xca5   : > { %s2137_s0 = scalar_lea.hbm %s2599_s24, 128  ;;  %s2141_s26 = scalar_lea.hbm %s2664_s17, 256 }
 0xca6   : > { %p2138_p6 = scmp.ne.s32.totalorder %s2599_s24, %s2137_s0  ;;  %p2142_p10 = scmp.lt.u32.totalorder %s2599_s24, %s2664_s17 }
 0xca7   : > { %p2143_p11 = scmp.lt.u32.totalorder %s2141_s26, %s2137_s0  ;;  %p2145_p13 = scmp.lt.u32.totalorder %s2137_s0, %s2599_s24 }
 0xca8   : > { %p2139_p7 = pnand %p2138_p6, %p2339_p4 }
 0xca9   : > { %p2144_p12 = por %p2143_p11, %p2142_p10 }
 0xcaa   : > { %p2140_p9 = pneg %p2139_p7 }
 0xcab   : > { %p2146_p0 = por %p2145_p13, %p2144_p12 }
 0xcad   : > { %p2147_p1 = pnand %p2146_p0, %p2140_p9 }
 0xcaf   : > { %2150 = shalt.err (!%p2147_p1)
}
 0xcb0   : > { %2022 = dma.vmem_to_hbm [thread:$0]  (%p2339_p4), %s2601_s2, 128, %s2599_s24, %s1648_s29  }
 0xcb1 PF: > { %s2687_s28 = sld [smem:[#allocation11_spill]]  ;;  %s2688_s18 = sld [smem:[#allocation8_spill]] }
 0xcb7   : > { %p2028_p2 = scmp.ge.s32.totalorder %s2687_s28, 2  ;;  %s1674_s23 = sand.u32 1, %s2688_s18  }
 0xcb8   : > { %s1675_s22 = scalar_lea.sflag [#allocation6], %s1674_s23 }
 0xcb9   : > { %p2025_p3 = pnand %p2028_p2, %p2346_p8 }
 0xcbb   : > { %2176 = dma.done.wait (!%p2025_p3), %s1675_s22, 128  }
 0xcbc   : > { %2178 = vsyncadd (!%p2025_p3), %s1675_s22, 4294967168  ;;  %s30_s29 = sadd.s32 1, %s2687_s28   ;;  %s2690_s0 = sld [smem:[#allocation9_spill]] }
 0xcbd   : > { %p27_p5 = scmp.ge.s32.totalorder %s30_s29, 4   ;;  %s2691_s26 = sld [smem:[#allocation14_spill]] }
 0xcbe   : > { %s2692_s27 = sld [smem:[#allocation10_spill]]  ;;  %s2693_s28 = sld [smem:[#allocation12_spill]] }
 0xcbf   : > { %s2694_s24 = smov %s2185_s25  ;;  %29 = sbr.rel (!%p27_p5) target bundleno = 8 (0x8), region = 140 }
 0xcc2   : > { %s2695_s25 = smov %s2690_s0 }
 0xcc6   :  { %1680 = vsyncpa [#allocation6], 1 }
 0xcc7   :  { %1682 = vsyncpa [#allocation6 + $0x1], 1 }

</bundles_post_ra>
